<compile_context>
chip_gen: v6e
topology: v6e:2x2x1
jax: 0.10.0
libtpu: 0.0.40
codegen_flags: <defaults>
</compile_context>

<pallas_src>
import math
from functools import partial

import jax
import jax.numpy as jnp
from jax.experimental import pallas as pl
from jax.experimental.pallas import tpu as pltpu


def _layer_norm(x, gamma, beta, eps):
    """Row-wise LayerNorm (biased variance, like torch.nn.LayerNorm)."""
    mean = jnp.mean(x, axis=-1, keepdims=True)
    xc = x - mean
    var = jnp.mean(xc * xc, axis=-1, keepdims=True)
    return xc * jax.lax.rsqrt(var + eps) * gamma + beta


def _transformer_layer_kernel(xq_ref, xkv_ref,
                              wq_ref, bq_ref, wkv_ref, bkv_ref,
                              wo_ref, bo_ref, g1_ref, be1_ref,
                              wi_ref, bi_ref, w2_ref, b2_ref, g2_ref, be2_ref,
                              out_ref, ctx_acc,
                              *, num_heads, head_dim, ln_eps):
    """One grid step = one (batch element, query-row tile)."""
    H = num_heads * head_dim
    xq = xq_ref[0]            # (TQ, H) query rows of this tile (also residual)
    xkv = xkv_ref[0]          # (S,  H) full sequence for K/V

    # Q projection (1/sqrt(d) already folded into wq/bq) and one fused K|V
    # projection: a single MXU matmul with 2x wider N.
    q = jnp.dot(xq, wq_ref[...], preferred_element_type=jnp.float32) + bq_ref[0]
    kv = jnp.dot(xkv, wkv_ref[...], preferred_element_type=jnp.float32) + bkv_ref[0]
    k = kv[:, :H]
    v = kv[:, H:]

    # Per-head attention. Contexts accumulate into a full-width f32 VMEM
    # scratch so the only HBM write is one lane-dense store of the final
    # layer output.  (Head count is small & static here; for nh >= 12 the
    # next step is batching heads into one 3-D einsum / fori_loop.)
    for h in range(num_heads):
        lo = h * head_dim
        hi = lo + head_dim
        qh = q[:, lo:hi]                 # (TQ, d)
        kh = k[:, lo:hi]                 # (S,  d)
        vh = v[:, lo:hi]                 # (S,  d)
        s = jnp.einsum('qd,kd->qk', qh, kh, preferred_element_type=jnp.float32)
        m = jnp.max(s, axis=-1, keepdims=True)
        e = jnp.exp(s - m)
        p = e * pl.reciprocal(jnp.sum(e, axis=-1, keepdims=True), approx=True)
        ctx_acc[:, lo:hi] = jnp.dot(p, vh, preferred_element_type=jnp.float32)

    ctx = ctx_acc[...]                   # (TQ, H) lane-dense f32

    # SelfOutput: dense + residual + LayerNorm
    attn = jnp.dot(ctx, wo_ref[...], preferred_element_type=jnp.float32) + bo_ref[0]
    attn = _layer_norm(attn + xq.astype(jnp.float32), g1_ref[0], be1_ref[0], ln_eps)

    # IntermediateLayer: dense + tanh
    inter = jnp.tanh(
        jnp.dot(attn, wi_ref[...], preferred_element_type=jnp.float32) + bi_ref[0])

    # OutputLayer: dense + residual + LayerNorm
    out = jnp.dot(inter, w2_ref[...], preferred_element_type=jnp.float32) + b2_ref[0]
    out = _layer_norm(out + attn, g2_ref[0], be2_ref[0], ln_eps)

    out_ref[0] = out.astype(out_ref.dtype)        # single lane-dense store


def transformer_layer(hidden_states, params, *, num_heads, q_tile=None,
                      ln_eps=1e-5, vmem_limit_bytes=32 * 1024 * 1024):
    """hidden_states: [B, S, H]; params: dict of (in,out)-layout weights."""
    B, S, H = hidden_states.shape
    assert H % num_heads == 0
    head_dim = H // num_heads
    inter_size = params['wi'].shape[1]

    if q_tile is None:
        q_tile = S
    assert S % q_tile == 0
    assert q_tile == S or q_tile % 8 == 0, "query tile must be (8,·)-aligned"
    n_q = S // q_tile

    # --- wrapper-level (free) weight prep ------------------------------------
    inv_sqrt_d = 1.0 / math.sqrt(head_dim)
    wq = params['wq'] * inv_sqrt_d                       # fold score scale in
    bq = (params['bq'] * inv_sqrt_d).reshape(1, H)
    wkv = jnp.concatenate([params['wk'], params['wv']], axis=1)   # (H, 2H)
    bkv = jnp.concatenate([params['bk'], params['bv']]).reshape(1, 2 * H)
    wo = params['wo']
    bo = params['bo'].reshape(1, H)
    g1 = params['ln1_g'].reshape(1, H)
    be1 = params['ln1_b'].reshape(1, H)
    wi = params['wi']
    bi = params['bi'].reshape(1, inter_size)
    w2 = params['w2']
    b2 = params['b2'].reshape(1, H)
    g2 = params['ln2_g'].reshape(1, H)
    be2 = params['ln2_b'].reshape(1, H)

    kernel = partial(_transformer_layer_kernel,
                     num_heads=num_heads, head_dim=head_dim, ln_eps=ln_eps)

    def _resident(arr):
        # Full-extent, grid-invariant block (weights / biases stay in VMEM).
        return pl.BlockSpec(arr.shape, lambda b, qi: (0, 0))

    # --- advisory cost estimate ----------------------------------------------
    flops = (2 * B * S * H * H                 # Q projection
             + 2 * B * S * H * (2 * H)         # fused K/V projection
             + 4 * B * S * S * H               # QK^T + probs@V over all heads
             + 2 * B * S * H * H               # attention output dense
             + 4 * B * S * H * inter_size)     # FFN up + down
    transcendentals = (B * num_heads * S * S   # exp
                       + B * S * inter_size    # tanh
                       + 4 * B * S)            # rsqrt / reciprocal
    bytes_accessed = 4 * (2 * B * S * H                       # x in + out
                          + 3 * H * H + 2 * H * inter_size    # weights
                          + 8 * H + 2 * inter_size)           # biases / LN
    cost = pl.CostEstimate(flops=flops, transcendentals=transcendentals,
                           bytes_accessed=bytes_accessed)

    return pl.pallas_call(
        kernel,
        out_shape=jax.ShapeDtypeStruct((B, S, H), hidden_states.dtype),
        grid_spec=pltpu.PrefetchScalarGridSpec(
            num_scalar_prefetch=0,
            grid=(B, n_q),
            in_specs=[
                pl.BlockSpec((1, q_tile, H), lambda b, qi: (b, qi, 0)),  # x (Q rows)
                pl.BlockSpec((1, S, H), lambda b, qi: (b, 0, 0)),        # x (K/V rows)
                _resident(wq), _resident(bq),
                _resident(wkv), _resident(bkv),
                _resident(wo), _resident(bo),
                _resident(g1), _resident(be1),
                _resident(wi), _resident(bi),
                _resident(w2), _resident(b2),
                _resident(g2), _resident(be2),
            ],
            out_specs=pl.BlockSpec((1, q_tile, H), lambda b, qi: (b, qi, 0)),
            scratch_shapes=[pltpu.VMEM((q_tile, H), jnp.float32)],
        ),
        compiler_params=pltpu.CompilerParams(
            dimension_semantics=("parallel", "parallel"),
            vmem_limit_bytes=vmem_limit_bytes),
        cost_estimate=cost,
    )(hidden_states, hidden_states,
      wq, bq, wkv, bkv, wo, bo, g1, be1, wi, bi, w2, b2, g2, be2)


def transformer_layer_reference(x, p, *, num_heads, ln_eps=1e-5):
    """Pure-JAX reference mirroring the PyTorch TransformerLayer (eval mode)."""
    B, S, H = x.shape
    d = H // num_heads

    q = x @ p['wq'] + p['bq']
    k = x @ p['wk'] + p['bk']
    v = x @ p['wv'] + p['bv']

    def split(t):
        return t.reshape(B, S, num_heads, d).transpose(0, 2, 1, 3)

    qh, kh, vh = split(q), split(k), split(v)
    scores = jnp.einsum('bhqd,bhkd->bhqk', qh, kh) / math.sqrt(d)
    probs = jax.nn.softmax(scores, axis=-1)
    ctx = jnp.einsum('bhqk,bhkd->bhqd', probs, vh)
    ctx = ctx.transpose(0, 2, 1, 3).reshape(B, S, H)

    def ln(t, g, b):
        mu = t.mean(-1, keepdims=True)
        var = ((t - mu) ** 2).mean(-1, keepdims=True)
        return (t - mu) / jnp.sqrt(var + ln_eps) * g + b

    attn = ln(ctx @ p['wo'] + p['bo'] + x, p['ln1_g'], p['ln1_b'])
    inter = jnp.tanh(attn @ p['wi'] + p['bi'])
    out = ln(inter @ p['w2'] + p['b2'] + attn, p['ln2_g'], p['ln2_b'])
    return out


if __name__ == "__main__":
    # Small config consistent with the module: hidden_size=32, heads=4,
    # input_length (seq)=8, intermediate_size=128, batch=2.
    B, S, H, NH = 2, 8, 32, 4
    INTER = 4 * H

    keys = jax.random.split(jax.random.PRNGKey(0), 18)

    def linear(kw, kb, fan_in, fan_out):
        s = 1.0 / math.sqrt(fan_in)
        w = jax.random.uniform(kw, (fan_in, fan_out), jnp.float32, -s, s)
        b = jax.random.uniform(kb, (fan_out,), jnp.float32, -s, s)
        return w, b

    x = jax.random.normal(keys[0], (B, S, H), dtype=jnp.float32)

    wq, bq = linear(keys[1], keys[2], H, H)
    wk, bk = linear(keys[3], keys[4], H, H)
    wv, bv = linear(keys[5], keys[6], H, H)
    wo, bo = linear(keys[7], keys[8], H, H)
    wi, bi = linear(keys[9], keys[10], H, INTER)
    w2, b2 = linear(keys[11], keys[12], INTER, H)

    params = dict(
        wq=wq, bq=bq, wk=wk, bk=bk, wv=wv, bv=bv, wo=wo, bo=bo,
        wi=wi, bi=bi, w2=w2, b2=b2,
        ln1_g=1.0 + 0.1 * jax.random.normal(keys[13], (H,), jnp.float32),
        ln1_b=0.1 * jax.random.normal(keys[14], (H,), jnp.float32),
        ln2_g=1.0 + 0.1 * jax.random.normal(keys[15], (H,), jnp.float32),
        ln2_b=0.1 * jax.random.normal(keys[16], (H,), jnp.float32),
    )

    out = transformer_layer(x, params, num_heads=NH)
    out = jax.block_until_ready(out)

    ref = transformer_layer_reference(x, params, num_heads=NH)
    # Tolerance covers the approximate-reciprocal softmax normalization.
    if not jnp.allclose(out, ref, atol=1e-2, rtol=1e-2):
        max_err = float(jnp.max(jnp.abs(out - ref)))
        raise AssertionError(f"kernel/reference mismatch, max abs err={max_err}")

    print("KERNEL_OK")
</pallas_src>

<mosaic_0001>
module attributes {stable_mosaic.version = 11 : i64} {
  func.func @_transformer_layer_kernel(%arg0: i32, %arg1: i32, %arg2: memref<1x8x32xf32, #tpu.memory_space<vmem>>, %arg3: memref<1x8x32xf32, #tpu.memory_space<vmem>>, %arg4: memref<32x32xf32, #tpu.memory_space<vmem>>, %arg5: memref<1x32xf32, #tpu.memory_space<vmem>>, %arg6: memref<32x64xf32, #tpu.memory_space<vmem>>, %arg7: memref<1x64xf32, #tpu.memory_space<vmem>>, %arg8: memref<32x32xf32, #tpu.memory_space<vmem>>, %arg9: memref<1x32xf32, #tpu.memory_space<vmem>>, %arg10: memref<1x32xf32, #tpu.memory_space<vmem>>, %arg11: memref<1x32xf32, #tpu.memory_space<vmem>>, %arg12: memref<32x128xf32, #tpu.memory_space<vmem>>, %arg13: memref<1x128xf32, #tpu.memory_space<vmem>>, %arg14: memref<128x32xf32, #tpu.memory_space<vmem>>, %arg15: memref<1x32xf32, #tpu.memory_space<vmem>>, %arg16: memref<1x32xf32, #tpu.memory_space<vmem>>, %arg17: memref<1x32xf32, #tpu.memory_space<vmem>>, %arg18: memref<1x8x32xf32, #tpu.memory_space<vmem>>, %arg19: memref<8x32xf32, #tpu.memory_space<vmem>>) attributes {dimension_semantics = [#tpu.dimension_semantics<parallel>, #tpu.dimension_semantics<parallel>], iteration_bounds = array<i64: 2, 1>, scalar_prefetch = 0 : i64, scratch_operands = 1 : i64, tpu.core_type = #tpu.core_type<tc>, window_params = [{transform_indices = @transform_0, window_bounds = array<i64: 1, 8, 32>}, {transform_indices = @transform_1, window_bounds = array<i64: 1, 8, 32>}, {pipeline_mode = #tpu.pipeline_mode<synchronous>, transform_indices = @transform_2, window_bounds = array<i64: 32, 32>}, {pipeline_mode = #tpu.pipeline_mode<synchronous>, transform_indices = @transform_3, window_bounds = array<i64: 1, 32>}, {pipeline_mode = #tpu.pipeline_mode<synchronous>, transform_indices = @transform_4, window_bounds = array<i64: 32, 64>}, {pipeline_mode = #tpu.pipeline_mode<synchronous>, transform_indices = @transform_5, window_bounds = array<i64: 1, 64>}, {pipeline_mode = #tpu.pipeline_mode<synchronous>, transform_indices = @transform_6, window_bounds = array<i64: 32, 32>}, {pipeline_mode = #tpu.pipeline_mode<synchronous>, transform_indices = @transform_7, window_bounds = array<i64: 1, 32>}, {pipeline_mode = #tpu.pipeline_mode<synchronous>, transform_indices = @transform_8, window_bounds = array<i64: 1, 32>}, {pipeline_mode = #tpu.pipeline_mode<synchronous>, transform_indices = @transform_9, window_bounds = array<i64: 1, 32>}, {pipeline_mode = #tpu.pipeline_mode<synchronous>, transform_indices = @transform_10, window_bounds = array<i64: 32, 128>}, {pipeline_mode = #tpu.pipeline_mode<synchronous>, transform_indices = @transform_11, window_bounds = array<i64: 1, 128>}, {pipeline_mode = #tpu.pipeline_mode<synchronous>, transform_indices = @transform_12, window_bounds = array<i64: 128, 32>}, {pipeline_mode = #tpu.pipeline_mode<synchronous>, transform_indices = @transform_13, window_bounds = array<i64: 1, 32>}, {pipeline_mode = #tpu.pipeline_mode<synchronous>, transform_indices = @transform_14, window_bounds = array<i64: 1, 32>}, {pipeline_mode = #tpu.pipeline_mode<synchronous>, transform_indices = @transform_15, window_bounds = array<i64: 1, 32>}, {transform_indices = @transform_16, window_bounds = array<i64: 1, 8, 32>}]} {
    %c0 = arith.constant 0 : index
    %c0_0 = arith.constant 0 : index
    %c0_1 = arith.constant 0 : index
    %0 = vector.load %arg2[%c0, %c0_0, %c0_1] : memref<1x8x32xf32, #tpu.memory_space<vmem>>, vector<1x8x32xf32>
    %1 = vector.shape_cast %0 : vector<1x8x32xf32> to vector<8x32xf32>
    %c0_2 = arith.constant 0 : index
    %c0_3 = arith.constant 0 : index
    %c0_4 = arith.constant 0 : index
    %2 = vector.load %arg3[%c0_2, %c0_3, %c0_4] : memref<1x8x32xf32, #tpu.memory_space<vmem>>, vector<1x8x32xf32>
    %3 = vector.shape_cast %2 : vector<1x8x32xf32> to vector<8x32xf32>
    %c0_5 = arith.constant 0 : index
    %c0_6 = arith.constant 0 : index
    %4 = vector.load %arg4[%c0_5, %c0_6] : memref<32x32xf32, #tpu.memory_space<vmem>>, vector<32x32xf32>
    %cst = arith.constant dense<0.000000e+00> : vector<8x32xf32>
    %5 = tpu.matmul %1, %4, %cst {dimension_numbers = #tpu.dot_dimension_numbers<[1], [0], [0], [1], [0, 0, 1, 1], [], []>} : vector<8x32xf32>, vector<32x32xf32>, vector<8x32xf32> -> vector<8x32xf32>
    %c0_7 = arith.constant 0 : index
    %c0_8 = arith.constant 0 : index
    %6 = vector.load %arg5[%c0_7, %c0_8] : memref<1x32xf32, #tpu.memory_space<vmem>>, vector<1x32xf32>
    %7 = vector.shape_cast %6 : vector<1x32xf32> to vector<32xf32>
    %8 = vector.shape_cast %7 : vector<32xf32> to vector<1x32xf32>
    %9 = vector.broadcast %8 : vector<1x32xf32> to vector<8x32xf32>
    %10 = arith.addf %5, %9 : vector<8x32xf32>
    %c0_9 = arith.constant 0 : index
    %c0_10 = arith.constant 0 : index
    %11 = vector.load %arg6[%c0_9, %c0_10] : memref<32x64xf32, #tpu.memory_space<vmem>>, vector<32x64xf32>
    %cst_11 = arith.constant dense<0.000000e+00> : vector<8x64xf32>
    %12 = tpu.matmul %3, %11, %cst_11 {dimension_numbers = #tpu.dot_dimension_numbers<[1], [0], [0], [1], [0, 0, 1, 1], [], []>} : vector<8x32xf32>, vector<32x64xf32>, vector<8x64xf32> -> vector<8x64xf32>
    %c0_12 = arith.constant 0 : index
    %c0_13 = arith.constant 0 : index
    %13 = vector.load %arg7[%c0_12, %c0_13] : memref<1x64xf32, #tpu.memory_space<vmem>>, vector<1x64xf32>
    %14 = vector.shape_cast %13 : vector<1x64xf32> to vector<64xf32>
    %15 = vector.shape_cast %14 : vector<64xf32> to vector<1x64xf32>
    %16 = vector.broadcast %15 : vector<1x64xf32> to vector<8x64xf32>
    %17 = arith.addf %12, %16 : vector<8x64xf32>
    %18 = vector.extract_strided_slice %17 {offsets = [0, 0], sizes = [8, 32], strides = [1, 1]} : vector<8x64xf32> to vector<8x32xf32>
    %19 = vector.extract_strided_slice %17 {offsets = [0, 32], sizes = [8, 32], strides = [1, 1]} : vector<8x64xf32> to vector<8x32xf32>
    %20 = vector.extract_strided_slice %10 {offsets = [0, 0], sizes = [8, 8], strides = [1, 1]} : vector<8x32xf32> to vector<8x8xf32>
    %21 = vector.extract_strided_slice %18 {offsets = [0, 0], sizes = [8, 8], strides = [1, 1]} : vector<8x32xf32> to vector<8x8xf32>
    %22 = vector.extract_strided_slice %19 {offsets = [0, 0], sizes = [8, 8], strides = [1, 1]} : vector<8x32xf32> to vector<8x8xf32>
    "tpu.trace_start"() <{level = 10 : i32, message = "qd,kd->qk"}> : () -> ()
    %cst_14 = arith.constant dense<0.000000e+00> : vector<8x8xf32>
    %23 = tpu.matmul %20, %21, %cst_14 {dimension_numbers = #tpu.dot_dimension_numbers<[1], [1], [0], [0], [0, 0, 1, 0], [], []>} : vector<8x8xf32>, vector<8x8xf32>, vector<8x8xf32> -> vector<8x8xf32>
    "tpu.trace_stop"() : () -> ()
    %cst_15 = arith.constant dense<0xFF800000> : vector<8xf32>
    %24 = vector.multi_reduction <maximumf>, %23, %cst_15 [1] : vector<8x8xf32> to vector<8xf32>
    %25 = vector.shape_cast %24 : vector<8xf32> to vector<8x1xf32>
    %26 = vector.broadcast %25 : vector<8x1xf32> to vector<8x8xf32>
    %27 = arith.subf %23, %26 : vector<8x8xf32>
    %28 = math.exp %27 : vector<8x8xf32>
    %cst_16 = arith.constant dense<0.000000e+00> : vector<8xf32>
    %29 = vector.multi_reduction <add>, %28, %cst_16 [1] : vector<8x8xf32> to vector<8xf32>
    %30 = vector.shape_cast %29 : vector<8xf32> to vector<8x1xf32>
    %31 = tpu.reciprocal %30 {approx = true} : vector<8x1xf32> -> vector<8x1xf32>
    %32 = vector.broadcast %31 : vector<8x1xf32> to vector<8x8xf32>
    %33 = arith.mulf %28, %32 : vector<8x8xf32>
    %cst_17 = arith.constant dense<0.000000e+00> : vector<8x8xf32>
    %34 = tpu.matmul %33, %22, %cst_17 {dimension_numbers = #tpu.dot_dimension_numbers<[1], [0], [0], [1], [0, 0, 1, 1], [], []>} : vector<8x8xf32>, vector<8x8xf32>, vector<8x8xf32> -> vector<8x8xf32>
    %c0_18 = arith.constant 0 : index
    %c0_19 = arith.constant 0 : index
    %35 = vector.load %arg19[%c0_18, %c0_19] : memref<8x32xf32, #tpu.memory_space<vmem>>, vector<8x8xf32>
    tpu.vector_store %arg19[%c0_18, %c0_19], %34 {strides = array<i32>} : memref<8x32xf32, #tpu.memory_space<vmem>>, vector<8x8xf32>,
    %36 = vector.extract_strided_slice %10 {offsets = [0, 8], sizes = [8, 8], strides = [1, 1]} : vector<8x32xf32> to vector<8x8xf32>
    %37 = vector.extract_strided_slice %18 {offsets = [0, 8], sizes = [8, 8], strides = [1, 1]} : vector<8x32xf32> to vector<8x8xf32>
    %38 = vector.extract_strided_slice %19 {offsets = [0, 8], sizes = [8, 8], strides = [1, 1]} : vector<8x32xf32> to vector<8x8xf32>
    "tpu.trace_start"() <{level = 10 : i32, message = "qd,kd->qk"}> : () -> ()
    %cst_20 = arith.constant dense<0.000000e+00> : vector<8x8xf32>
    %39 = tpu.matmul %36, %37, %cst_20 {dimension_numbers = #tpu.dot_dimension_numbers<[1], [1], [0], [0], [0, 0, 1, 0], [], []>} : vector<8x8xf32>, vector<8x8xf32>, vector<8x8xf32> -> vector<8x8xf32>
    "tpu.trace_stop"() : () -> ()
    %cst_21 = arith.constant dense<0xFF800000> : vector<8xf32>
    %40 = vector.multi_reduction <maximumf>, %39, %cst_21 [1] : vector<8x8xf32> to vector<8xf32>
    %41 = vector.shape_cast %40 : vector<8xf32> to vector<8x1xf32>
    %42 = vector.broadcast %41 : vector<8x1xf32> to vector<8x8xf32>
    %43 = arith.subf %39, %42 : vector<8x8xf32>
    %44 = math.exp %43 : vector<8x8xf32>
    %cst_22 = arith.constant dense<0.000000e+00> : vector<8xf32>
    %45 = vector.multi_reduction <add>, %44, %cst_22 [1] : vector<8x8xf32> to vector<8xf32>
    %46 = vector.shape_cast %45 : vector<8xf32> to vector<8x1xf32>
    %47 = tpu.reciprocal %46 {approx = true} : vector<8x1xf32> -> vector<8x1xf32>
    %48 = vector.broadcast %47 : vector<8x1xf32> to vector<8x8xf32>
    %49 = arith.mulf %44, %48 : vector<8x8xf32>
    %cst_23 = arith.constant dense<0.000000e+00> : vector<8x8xf32>
    %50 = tpu.matmul %49, %38, %cst_23 {dimension_numbers = #tpu.dot_dimension_numbers<[1], [0], [0], [1], [0, 0, 1, 1], [], []>} : vector<8x8xf32>, vector<8x8xf32>, vector<8x8xf32> -> vector<8x8xf32>
    %c0_24 = arith.constant 0 : index
    %c8 = arith.constant 8 : index
    %51 = vector.load %arg19[%c0_24, %c8] : memref<8x32xf32, #tpu.memory_space<vmem>>, vector<8x8xf32>
    tpu.vector_store %arg19[%c0_24, %c8], %50 {strides = array<i32>} : memref<8x32xf32, #tpu.memory_space<vmem>>, vector<8x8xf32>,
    %52 = vector.extract_strided_slice %10 {offsets = [0, 16], sizes = [8, 8], strides = [1, 1]} : vector<8x32xf32> to vector<8x8xf32>
    %53 = vector.extract_strided_slice %18 {offsets = [0, 16], sizes = [8, 8], strides = [1, 1]} : vector<8x32xf32> to vector<8x8xf32>
    %54 = vector.extract_strided_slice %19 {offsets = [0, 16], sizes = [8, 8], strides = [1, 1]} : vector<8x32xf32> to vector<8x8xf32>
    "tpu.trace_start"() <{level = 10 : i32, message = "qd,kd->qk"}> : () -> ()
    %cst_25 = arith.constant dense<0.000000e+00> : vector<8x8xf32>
    %55 = tpu.matmul %52, %53, %cst_25 {dimension_numbers = #tpu.dot_dimension_numbers<[1], [1], [0], [0], [0, 0, 1, 0], [], []>} : vector<8x8xf32>, vector<8x8xf32>, vector<8x8xf32> -> vector<8x8xf32>
    "tpu.trace_stop"() : () -> ()
    %cst_26 = arith.constant dense<0xFF800000> : vector<8xf32>
    %56 = vector.multi_reduction <maximumf>, %55, %cst_26 [1] : vector<8x8xf32> to vector<8xf32>
    %57 = vector.shape_cast %56 : vector<8xf32> to vector<8x1xf32>
    %58 = vector.broadcast %57 : vector<8x1xf32> to vector<8x8xf32>
    %59 = arith.subf %55, %58 : vector<8x8xf32>
    %60 = math.exp %59 : vector<8x8xf32>
    %cst_27 = arith.constant dense<0.000000e+00> : vector<8xf32>
    %61 = vector.multi_reduction <add>, %60, %cst_27 [1] : vector<8x8xf32> to vector<8xf32>
    %62 = vector.shape_cast %61 : vector<8xf32> to vector<8x1xf32>
    %63 = tpu.reciprocal %62 {approx = true} : vector<8x1xf32> -> vector<8x1xf32>
    %64 = vector.broadcast %63 : vector<8x1xf32> to vector<8x8xf32>
    %65 = arith.mulf %60, %64 : vector<8x8xf32>
    %cst_28 = arith.constant dense<0.000000e+00> : vector<8x8xf32>
    %66 = tpu.matmul %65, %54, %cst_28 {dimension_numbers = #tpu.dot_dimension_numbers<[1], [0], [0], [1], [0, 0, 1, 1], [], []>} : vector<8x8xf32>, vector<8x8xf32>, vector<8x8xf32> -> vector<8x8xf32>
    %c0_29 = arith.constant 0 : index
    %c16 = arith.constant 16 : index
    %67 = vector.load %arg19[%c0_29, %c16] : memref<8x32xf32, #tpu.memory_space<vmem>>, vector<8x8xf32>
    tpu.vector_store %arg19[%c0_29, %c16], %66 {strides = array<i32>} : memref<8x32xf32, #tpu.memory_space<vmem>>, vector<8x8xf32>,
    %68 = vector.extract_strided_slice %10 {offsets = [0, 24], sizes = [8, 8], strides = [1, 1]} : vector<8x32xf32> to vector<8x8xf32>
    %69 = vector.extract_strided_slice %18 {offsets = [0, 24], sizes = [8, 8], strides = [1, 1]} : vector<8x32xf32> to vector<8x8xf32>
    %70 = vector.extract_strided_slice %19 {offsets = [0, 24], sizes = [8, 8], strides = [1, 1]} : vector<8x32xf32> to vector<8x8xf32>
    "tpu.trace_start"() <{level = 10 : i32, message = "qd,kd->qk"}> : () -> ()
    %cst_30 = arith.constant dense<0.000000e+00> : vector<8x8xf32>
    %71 = tpu.matmul %68, %69, %cst_30 {dimension_numbers = #tpu.dot_dimension_numbers<[1], [1], [0], [0], [0, 0, 1, 0], [], []>} : vector<8x8xf32>, vector<8x8xf32>, vector<8x8xf32> -> vector<8x8xf32>
    "tpu.trace_stop"() : () -> ()
    %cst_31 = arith.constant dense<0xFF800000> : vector<8xf32>
    %72 = vector.multi_reduction <maximumf>, %71, %cst_31 [1] : vector<8x8xf32> to vector<8xf32>
    %73 = vector.shape_cast %72 : vector<8xf32> to vector<8x1xf32>
    %74 = vector.broadcast %73 : vector<8x1xf32> to vector<8x8xf32>
    %75 = arith.subf %71, %74 : vector<8x8xf32>
    %76 = math.exp %75 : vector<8x8xf32>
    %cst_32 = arith.constant dense<0.000000e+00> : vector<8xf32>
    %77 = vector.multi_reduction <add>, %76, %cst_32 [1] : vector<8x8xf32> to vector<8xf32>
    %78 = vector.shape_cast %77 : vector<8xf32> to vector<8x1xf32>
    %79 = tpu.reciprocal %78 {approx = true} : vector<8x1xf32> -> vector<8x1xf32>
    %80 = vector.broadcast %79 : vector<8x1xf32> to vector<8x8xf32>
    %81 = arith.mulf %76, %80 : vector<8x8xf32>
    %cst_33 = arith.constant dense<0.000000e+00> : vector<8x8xf32>
    %82 = tpu.matmul %81, %70, %cst_33 {dimension_numbers = #tpu.dot_dimension_numbers<[1], [0], [0], [1], [0, 0, 1, 1], [], []>} : vector<8x8xf32>, vector<8x8xf32>, vector<8x8xf32> -> vector<8x8xf32>
    %c0_34 = arith.constant 0 : index
    %c24 = arith.constant 24 : index
    %83 = vector.load %arg19[%c0_34, %c24] : memref<8x32xf32, #tpu.memory_space<vmem>>, vector<8x8xf32>
    tpu.vector_store %arg19[%c0_34, %c24], %82 {strides = array<i32>} : memref<8x32xf32, #tpu.memory_space<vmem>>, vector<8x8xf32>,
    %c0_35 = arith.constant 0 : index
    %c0_36 = arith.constant 0 : index
    %84 = vector.load %arg19[%c0_35, %c0_36] : memref<8x32xf32, #tpu.memory_space<vmem>>, vector<8x32xf32>
    %c0_37 = arith.constant 0 : index
    %c0_38 = arith.constant 0 : index
    %85 = vector.load %arg8[%c0_37, %c0_38] : memref<32x32xf32, #tpu.memory_space<vmem>>, vector<32x32xf32>
    %cst_39 = arith.constant dense<0.000000e+00> : vector<8x32xf32>
    %86 = tpu.matmul %84, %85, %cst_39 {dimension_numbers = #tpu.dot_dimension_numbers<[1], [0], [0], [1], [0, 0, 1, 1], [], []>} : vector<8x32xf32>, vector<32x32xf32>, vector<8x32xf32> -> vector<8x32xf32>
    %c0_40 = arith.constant 0 : index
    %c0_41 = arith.constant 0 : index
    %87 = vector.load %arg9[%c0_40, %c0_41] : memref<1x32xf32, #tpu.memory_space<vmem>>, vector<1x32xf32>
    %88 = vector.shape_cast %87 : vector<1x32xf32> to vector<32xf32>
    %89 = vector.shape_cast %88 : vector<32xf32> to vector<1x32xf32>
    %90 = vector.broadcast %89 : vector<1x32xf32> to vector<8x32xf32>
    %91 = arith.addf %86, %90 : vector<8x32xf32>
    %92 = arith.addf %91, %1 : vector<8x32xf32>
    %c0_42 = arith.constant 0 : index
    %c0_43 = arith.constant 0 : index
    %93 = vector.load %arg10[%c0_42, %c0_43] : memref<1x32xf32, #tpu.memory_space<vmem>>, vector<1x32xf32>
    %94 = vector.shape_cast %93 : vector<1x32xf32> to vector<32xf32>
    %c0_44 = arith.constant 0 : index
    %c0_45 = arith.constant 0 : index
    %95 = vector.load %arg11[%c0_44, %c0_45] : memref<1x32xf32, #tpu.memory_space<vmem>>, vector<1x32xf32>
    %96 = vector.shape_cast %95 : vector<1x32xf32> to vector<32xf32>
    %cst_46 = arith.constant dense<0.000000e+00> : vector<8xf32>
    %97 = vector.multi_reduction <add>, %92, %cst_46 [1] : vector<8x32xf32> to vector<8xf32>
    %98 = vector.shape_cast %97 : vector<8xf32> to vector<8x1xf32>
    %cst_47 = arith.constant 3.200000e+01 : f32
    %99 = vector.broadcast %cst_47 : f32 to vector<8x1xf32>
    %100 = arith.divf %98, %99 : vector<8x1xf32>
    %101 = vector.broadcast %100 : vector<8x1xf32> to vector<8x32xf32>
    %102 = arith.subf %92, %101 : vector<8x32xf32>
    %103 = arith.mulf %102, %102 : vector<8x32xf32>
    %cst_48 = arith.constant dense<0.000000e+00> : vector<8xf32>
    %104 = vector.multi_reduction <add>, %103, %cst_48 [1] : vector<8x32xf32> to vector<8xf32>
    %105 = vector.shape_cast %104 : vector<8xf32> to vector<8x1xf32>
    %cst_49 = arith.constant 3.200000e+01 : f32
    %106 = vector.broadcast %cst_49 : f32 to vector<8x1xf32>
    %107 = arith.divf %105, %106 : vector<8x1xf32>
    %cst_50 = arith.constant 9.99999974E-6 : f32
    %108 = vector.broadcast %cst_50 : f32 to vector<8x1xf32>
    %109 = arith.addf %107, %108 : vector<8x1xf32>
    %110 = math.rsqrt %109 : vector<8x1xf32>
    %111 = vector.broadcast %110 : vector<8x1xf32> to vector<8x32xf32>
    %112 = arith.mulf %102, %111 : vector<8x32xf32>
    %113 = vector.shape_cast %94 : vector<32xf32> to vector<1x32xf32>
    %114 = vector.broadcast %113 : vector<1x32xf32> to vector<8x32xf32>
    %115 = arith.mulf %112, %114 : vector<8x32xf32>
    %116 = vector.shape_cast %96 : vector<32xf32> to vector<1x32xf32>
    %117 = vector.broadcast %116 : vector<1x32xf32> to vector<8x32xf32>
    %118 = arith.addf %115, %117 : vector<8x32xf32>
    %c0_51 = arith.constant 0 : index
    %c0_52 = arith.constant 0 : index
    %119 = vector.load %arg12[%c0_51, %c0_52] : memref<32x128xf32, #tpu.memory_space<vmem>>, vector<32x128xf32>
    %cst_53 = arith.constant dense<0.000000e+00> : vector<8x128xf32>
    %120 = tpu.matmul %118, %119, %cst_53 {dimension_numbers = #tpu.dot_dimension_numbers<[1], [0], [0], [1], [0, 0, 1, 1], [], []>} : vector<8x32xf32>, vector<32x128xf32>, vector<8x128xf32> -> vector<8x128xf32>
    %c0_54 = arith.constant 0 : index
    %c0_55 = arith.constant 0 : index
    %121 = vector.load %arg13[%c0_54, %c0_55] : memref<1x128xf32, #tpu.memory_space<vmem>>, vector<1x128xf32>
    %122 = vector.shape_cast %121 : vector<1x128xf32> to vector<128xf32>
    %123 = vector.shape_cast %122 : vector<128xf32> to vector<1x128xf32>
    %124 = vector.broadcast %123 : vector<1x128xf32> to vector<8x128xf32>
    %125 = arith.addf %120, %124 : vector<8x128xf32>
    %126 = math.tanh %125 : vector<8x128xf32>
    %c0_56 = arith.constant 0 : index
    %c0_57 = arith.constant 0 : index
    %127 = vector.load %arg14[%c0_56, %c0_57] : memref<128x32xf32, #tpu.memory_space<vmem>>, vector<128x32xf32>
    %cst_58 = arith.constant dense<0.000000e+00> : vector<8x32xf32>
    %128 = tpu.matmul %126, %127, %cst_58 {dimension_numbers = #tpu.dot_dimension_numbers<[1], [0], [0], [1], [0, 0, 1, 1], [], []>} : vector<8x128xf32>, vector<128x32xf32>, vector<8x32xf32> -> vector<8x32xf32>
    %c0_59 = arith.constant 0 : index
    %c0_60 = arith.constant 0 : index
    %129 = vector.load %arg15[%c0_59, %c0_60] : memref<1x32xf32, #tpu.memory_space<vmem>>, vector<1x32xf32>
    %130 = vector.shape_cast %129 : vector<1x32xf32> to vector<32xf32>
    %131 = vector.shape_cast %130 : vector<32xf32> to vector<1x32xf32>
    %132 = vector.broadcast %131 : vector<1x32xf32> to vector<8x32xf32>
    %133 = arith.addf %128, %132 : vector<8x32xf32>
    %134 = arith.addf %133, %118 : vector<8x32xf32>
    %c0_61 = arith.constant 0 : index
    %c0_62 = arith.constant 0 : index
    %135 = vector.load %arg16[%c0_61, %c0_62] : memref<1x32xf32, #tpu.memory_space<vmem>>, vector<1x32xf32>
    %136 = vector.shape_cast %135 : vector<1x32xf32> to vector<32xf32>
    %c0_63 = arith.constant 0 : index
    %c0_64 = arith.constant 0 : index
    %137 = vector.load %arg17[%c0_63, %c0_64] : memref<1x32xf32, #tpu.memory_space<vmem>>, vector<1x32xf32>
    %138 = vector.shape_cast %137 : vector<1x32xf32> to vector<32xf32>
    %cst_65 = arith.constant dense<0.000000e+00> : vector<8xf32>
    %139 = vector.multi_reduction <add>, %134, %cst_65 [1] : vector<8x32xf32> to vector<8xf32>
    %140 = vector.shape_cast %139 : vector<8xf32> to vector<8x1xf32>
    %cst_66 = arith.constant 3.200000e+01 : f32
    %141 = vector.broadcast %cst_66 : f32 to vector<8x1xf32>
    %142 = arith.divf %140, %141 : vector<8x1xf32>
    %143 = vector.broadcast %142 : vector<8x1xf32> to vector<8x32xf32>
    %144 = arith.subf %134, %143 : vector<8x32xf32>
    %145 = arith.mulf %144, %144 : vector<8x32xf32>
    %cst_67 = arith.constant dense<0.000000e+00> : vector<8xf32>
    %146 = vector.multi_reduction <add>, %145, %cst_67 [1] : vector<8x32xf32> to vector<8xf32>
    %147 = vector.shape_cast %146 : vector<8xf32> to vector<8x1xf32>
    %cst_68 = arith.constant 3.200000e+01 : f32
    %148 = vector.broadcast %cst_68 : f32 to vector<8x1xf32>
    %149 = arith.divf %147, %148 : vector<8x1xf32>
    %cst_69 = arith.constant 9.99999974E-6 : f32
    %150 = vector.broadcast %cst_69 : f32 to vector<8x1xf32>
    %151 = arith.addf %149, %150 : vector<8x1xf32>
    %152 = math.rsqrt %151 : vector<8x1xf32>
    %153 = vector.broadcast %152 : vector<8x1xf32> to vector<8x32xf32>
    %154 = arith.mulf %144, %153 : vector<8x32xf32>
    %155 = vector.shape_cast %136 : vector<32xf32> to vector<1x32xf32>
    %156 = vector.broadcast %155 : vector<1x32xf32> to vector<8x32xf32>
    %157 = arith.mulf %154, %156 : vector<8x32xf32>
    %158 = vector.shape_cast %138 : vector<32xf32> to vector<1x32xf32>
    %159 = vector.broadcast %158 : vector<1x32xf32> to vector<8x32xf32>
    %160 = arith.addf %157, %159 : vector<8x32xf32>
    %c0_70 = arith.constant 0 : index
    %c0_71 = arith.constant 0 : index
    %c0_72 = arith.constant 0 : index
    %161 = vector.load %arg18[%c0_70, %c0_71, %c0_72] : memref<1x8x32xf32, #tpu.memory_space<vmem>>, vector<1x8x32xf32>
    %162 = vector.shape_cast %161 : vector<1x8x32xf32> to vector<8x32xf32>
    %163 = vector.shape_cast %160 : vector<8x32xf32> to vector<1x8x32xf32>
    tpu.vector_store %arg18[%c0_70, %c0_71, %c0_72], %163 {strides = array<i32>} : memref<1x8x32xf32, #tpu.memory_space<vmem>>, vector<1x8x32xf32>,
    return
  }
  func.func @transform_0(%arg0: i32, %arg1: i32) -> (i32, i32, i32) {
    %c0_i32 = arith.constant 0 : i32
    %c0_i32_0 = arith.constant 0 : i32
    return %arg0, %arg1, %c0_i32 : i32, i32, i32
  }
  func.func @transform_1(%arg0: i32, %arg1: i32) -> (i32, i32, i32) {
    %c0_i32 = arith.constant 0 : i32
    %c0_i32_0 = arith.constant 0 : i32
    %c0_i32_1 = arith.constant 0 : i32
    return %arg0, %c0_i32, %c0_i32_0 : i32, i32, i32
  }
  func.func @transform_2(%arg0: i32, %arg1: i32) -> (i32, i32) {
    %c0_i32 = arith.constant 0 : i32
    %c0_i32_0 = arith.constant 0 : i32
    %c0_i32_1 = arith.constant 0 : i32
    return %c0_i32, %c0_i32_0 : i32, i32
  }
  func.func @transform_3(%arg0: i32, %arg1: i32) -> (i32, i32) {
    %c0_i32 = arith.constant 0 : i32
    %c0_i32_0 = arith.constant 0 : i32
    %c0_i32_1 = arith.constant 0 : i32
    return %c0_i32, %c0_i32_0 : i32, i32
  }
  func.func @transform_4(%arg0: i32, %arg1: i32) -> (i32, i32) {
    %c0_i32 = arith.constant 0 : i32
    %c0_i32_0 = arith.constant 0 : i32
    %c0_i32_1 = arith.constant 0 : i32
    return %c0_i32, %c0_i32_0 : i32, i32
  }
  func.func @transform_5(%arg0: i32, %arg1: i32) -> (i32, i32) {
    %c0_i32 = arith.constant 0 : i32
    %c0_i32_0 = arith.constant 0 : i32
    %c0_i32_1 = arith.constant 0 : i32
    return %c0_i32, %c0_i32_0 : i32, i32
  }
  func.func @transform_6(%arg0: i32, %arg1: i32) -> (i32, i32) {
    %c0_i32 = arith.constant 0 : i32
    %c0_i32_0 = arith.constant 0 : i32
    %c0_i32_1 = arith.constant 0 : i32
    return %c0_i32, %c0_i32_0 : i32, i32
  }
  func.func @transform_7(%arg0: i32, %arg1: i32) -> (i32, i32) {
    %c0_i32 = arith.constant 0 : i32
    %c0_i32_0 = arith.constant 0 : i32
    %c0_i32_1 = arith.constant 0 : i32
    return %c0_i32, %c0_i32_0 : i32, i32
  }
  func.func @transform_8(%arg0: i32, %arg1: i32) -> (i32, i32) {
    %c0_i32 = arith.constant 0 : i32
    %c0_i32_0 = arith.constant 0 : i32
    %c0_i32_1 = arith.constant 0 : i32
    return %c0_i32, %c0_i32_0 : i32, i32
  }
  func.func @transform_9(%arg0: i32, %arg1: i32) -> (i32, i32) {
    %c0_i32 = arith.constant 0 : i32
    %c0_i32_0 = arith.constant 0 : i32
    %c0_i32_1 = arith.constant 0 : i32
    return %c0_i32, %c0_i32_0 : i32, i32
  }
  func.func @transform_10(%arg0: i32, %arg1: i32) -> (i32, i32) {
    %c0_i32 = arith.constant 0 : i32
    %c0_i32_0 = arith.constant 0 : i32
    %c0_i32_1 = arith.constant 0 : i32
    return %c0_i32, %c0_i32_0 : i32, i32
  }
  func.func @transform_11(%arg0: i32, %arg1: i32) -> (i32, i32) {
    %c0_i32 = arith.constant 0 : i32
    %c0_i32_0 = arith.constant 0 : i32
    %c0_i32_1 = arith.constant 0 : i32
    return %c0_i32, %c0_i32_0 : i32, i32
  }
  func.func @transform_12(%arg0: i32, %arg1: i32) -> (i32, i32) {
    %c0_i32 = arith.constant 0 : i32
    %c0_i32_0 = arith.constant 0 : i32
    %c0_i32_1 = arith.constant 0 : i32
    return %c0_i32, %c0_i32_0 : i32, i32
  }
  func.func @transform_13(%arg0: i32, %arg1: i32) -> (i32, i32) {
    %c0_i32 = arith.constant 0 : i32
    %c0_i32_0 = arith.constant 0 : i32
    %c0_i32_1 = arith.constant 0 : i32
    return %c0_i32, %c0_i32_0 : i32, i32
  }
  func.func @transform_14(%arg0: i32, %arg1: i32) -> (i32, i32) {
    %c0_i32 = arith.constant 0 : i32
    %c0_i32_0 = arith.constant 0 : i32
    %c0_i32_1 = arith.constant 0 : i32
    return %c0_i32, %c0_i32_0 : i32, i32
  }
  func.func @transform_15(%arg0: i32, %arg1: i32) -> (i32, i32) {
    %c0_i32 = arith.constant 0 : i32
    %c0_i32_0 = arith.constant 0 : i32
    %c0_i32_1 = arith.constant 0 : i32
    return %c0_i32, %c0_i32_0 : i32, i32
  }
  func.func @transform_16(%arg0: i32, %arg1: i32) -> (i32, i32, i32) {
    %c0_i32 = arith.constant 0 : i32
    %c0_i32_0 = arith.constant 0 : i32
    return %arg0, %arg1, %c0_i32 : i32, i32, i32
  }
}

</mosaic_0001>

<bundles_post_ra>
// kernel: tpu_custom_call.1
= control target key start
LH: loop header
LB: loop body
LE: loop exit
PB: predicated region body
PF: predicated region fallthrough
CT: control target
= control target key end

     0   :  { %s2640_s0 = inlined_call_operand.vmem [shape: f32[2,8,32], index: 0, kind: input, shape index: {}]   ;;  %s2641_s1 = inlined_call_operand.vmem [shape: f32[2,8,32], index: 1, kind: input, shape index: {}]   ;;  %s2642_s2 = inlined_call_operand.vmem [shape: f32[32,32], index: 2, kind: input, shape index: {}]   ;;  %s2643_s3 = inlined_call_operand.vmem [shape: f32[1,32], index: 3, kind: input, shape index: {}]   ;;  %s2644_s4 = inlined_call_operand.vmem [shape: f32[32,64], index: 4, kind: input, shape index: {}]   ;;  %s2645_s5 = inlined_call_operand.vmem [shape: f32[1,64], index: 5, kind: input, shape index: {}]   ;;  %s2646_s6 = inlined_call_operand.vmem [shape: f32[32,32], index: 6, kind: input, shape index: {}]   ;;  %s2647_s7 = inlined_call_operand.vmem [shape: f32[1,32], index: 7, kind: input, shape index: {}]   ;;  %s2648_s8 = inlined_call_operand.vmem [shape: f32[1,32], index: 8, kind: input, shape index: {}]   ;;  %s2649_s9 = inlined_call_operand.vmem [shape: f32[1,32], index: 9, kind: input, shape index: {}]   ;;  %s2650_s10 = inlined_call_operand.vmem [shape: f32[32,128], index: 10, kind: input, shape index: {}]   ;;  %s2651_s11 = inlined_call_operand.vmem [shape: f32[1,128], index: 11, kind: input, shape index: {}]   ;;  %s2652_s12 = inlined_call_operand.vmem [shape: f32[128,32], index: 12, kind: input, shape index: {}]   ;;  %s2653_s13 = inlined_call_operand.vmem [shape: f32[1,32], index: 13, kind: input, shape index: {}]   ;;  %s2654_s14 = inlined_call_operand.vmem [shape: f32[1,32], index: 14, kind: input, shape index: {}]   ;;  %s2655_s15 = inlined_call_operand.vmem [shape: f32[1,32], index: 15, kind: input, shape index: {}]   ;;  %s2656_s16 = inlined_call_operand.hbm [shape: f32[2,8,32], index: 16, kind: output, shape index: {}]  }
   0x1   :  { %2661 = sst [smem:[#allocation11_spill]] %s2640_s0 }
   0x2   :  { %2662 = sst [smem:[#allocation12_spill]] %s2641_s1 }
   0x3   :  { %2663 = sst [smem:[#allocation13_spill]] %s2642_s2 }
   0x4   :  { %2664 = sst [smem:[#allocation14_spill]] %s2643_s3 }
   0x5   :  { %21 = vsyncpa [#allocation4], 0 }
   0x6   :  { %23 = vsyncpa [#allocation4 + $0x1], 0  ;;  %s2305_s21 = smov 0   ;;  %s2307_s22 = smov 0  }
   0x7   :  { %s2309_s23 = smov 0   ;;  %s2311_s24 = smov 0  }
   0x8   :  { %s2313_s25 = smov 0   ;;  %s2315_s26 = smov 0  }
   0x9 LB: > { %2665 = sst [smem:[#allocation6_spill]] %s2193_s23  ;;  %s1831_s27 = sadd.s32 4294967295, %s2205_s26   ;;  %s2205_s26 = sphi %s2315_s26, %s29_s26   ;;  %s2201_s25 = sphi %s2313_s25, %s2680_s25   ;;  %s2197_s24 = sphi %s2311_s24, %s2679_s24   ;;  %s2193_s23 = sphi %s2309_s23, %s2678_s23   ;;  %s2189_s22 = sphi %s2307_s22, %s2682_s22   ;;  %s2185_s21 = sphi %s2305_s21, %s2681_s21  }
   0xa   : > { %2666 = sst [smem:[#allocation7_spill]] %s2201_s25  ;;  %s1832_s28 = sadd.s32 4294967294, %s2205_s26  }
   0xb   : > { %s41_s29 = sadd.s32 1, %s2201_s25  ;;  %s398_s30 = sadd.s32 1, %s2193_s23 }
   0xc   : > { %p43_p0 = scmp.ge.s32.totalorder %s41_s29, 2  ;;  %p408_p1 = scmp.ne.s32.totalorder %s2193_s23, %s2189_s22 }
   0xd   : > { %p409_p2 = scmp.eq.s32.totalorder %s1831_s27, 1  ;;  %p414_p3 = scmp.ne.s32.totalorder %s2189_s22, %s2185_s21 }
   0xe   : > { %s2684_s29 = smov (%p43_p0, %s41_s29), 0  ;;  %p415_p5 = scmp.eq.s32.totalorder %s1832_s28, 1 }
   0xf   : > { %2667 = sst [smem:[#allocation8_spill]] %s2684_s29  ;;  %p2345_p4 = por %p409_p2, %p408_p1 }
  0x10   : > { %s393_s17 = ssub.s32 %s2201_s25, %s2684_s29  ;;  %p1835_p6 = scmp.ge.s32.totalorder %s2205_s26, 1 }
  0x11   : > { %p396_p7 = scmp.eq.s32.totalorder %s393_s17, 0  ;;  %p2352_p8 = por %p415_p5, %p414_p3 }
  0x12   : > { %p492_p9 = scmp.lt.s32.totalorder %s2205_s26, 3 }
  0x13   : > { %s2669_s18 = scalar_select %p2352_p8, 1, 0 }
  0x14   : > { %s2358_s19 = scalar_select %p396_p7, %s2193_s23, %s398_s30  }
  0x15   : > { %2670 = sst [smem:[#allocation9_spill]] %s2669_s18  ;;  %p493_p10 = pnand %p1835_p6, %p492_p9 }
  0x16   : > { %2671 = sst [smem:[#allocation10_spill]] %s2358_s19  ;;  %p548_p11 = scmp.lt.s32.totalorder (!%p493_p10), %s2197_s24, 1 }
  0x17   : > { %496 = sbr.rel (%p493_p10) target bundleno = 2421 (0x975), region = 84  ;;  %s2672_s2 = sld [smem:[#allocation13_spill]] (!%p493_p10) }
  0x18   : > { %s2673_s23 = sld [smem:[#allocation11_spill]] (!%p493_p10)  ;;  %s2209_s25 = smov (!%p493_p10), 112  }
  0x19   : > { %s2674_s1 = sld [smem:[#allocation12_spill]] (!%p493_p10)  ;;  %s2211_s19 = smov (!%p493_p10), 104  }
  0x1a   : > { %s2675_s3 = sld [smem:[#allocation14_spill]] (!%p493_p10)  ;;  %s2212_s17 = smov (!%p493_p10), 96  }
  0x1b   : > { %s2213_s20 = smov (!%p493_p10), 80   ;;  %s2214_s27 = smov (!%p493_p10), 72  }
  0x1c   : > { %v2207_v1 = vmov 0.0   ;;  %vm2208_vm0 = vmmov 0   ;;  %s549_s30 = scalar_select %p548_p11, %s2197_s24, 1  ;;  %vm572_vm1 = vcmask 261120   ;;  %v649_v6 = vld [vmem:[%s2644_s4 + $0x18] sm:$0xff]  ;;  %v648_v7 = vld [vmem:[%s2644_s4 + $0x10] sm:$0xff] }
  0x1d   : > { %v564_v0 = vld [vmem:[%s2672_s2 + $0x18] sm:$0xff]  ;;  %1921 = vmatprep.subr.mxu1 %v2207_v1  ;;  %v563_v2 = vld [vmem:[%s2672_s2 + $0x10] sm:$0xff]  ;;  %1929 = vmatprep.mubr.msk.f32.mxu1 %vm2208_vm0, %v2207_v1  ;;  %v562_v3 = vld [vmem:[%s2672_s2 + $0x8] sm:$0xff]  ;;  %vm730_vm2 = vcmask 64512   ;;  %s2218_s29 = smov 24   ;;  %vm1064_vm3 = vcmask 130112  }
  0x1e   : > { %1922 = vmatpush3.msra.mxu1 %v564_v0  ;;  %1943 = vmatprep.subr.mxu0 %v2207_v1  ;;  %s1837_s28 = sshll.u32 %s549_s30, 3  ;;  %v561_v4 = vld [vmem:[%s2672_s2] sm:$0xff]  ;;  %v647_v8 = vld [vmem:[%s2644_s4 + $0x8] sm:$0xff]  ;;  %vm1235_vm4 = vcmask 195712   ;;  %vm1406_vm5 = vcmask 261312   ;;  %s545_s30 = sand.u32 1, %s2189_s22  }
  0x1f   : > { %1923 = vmatprep.subr.mxu1 %v2207_v1  ;;  %1945 = vmatprep.mubr.msk.f32.mxu0 %vm2208_vm0, %v2207_v1  ;;  %s554_s18 = scalar_lea.vmem %s2673_s23, %s1837_s28  ;;  %v646_v9 = vld [vmem:[%s2644_s4] sm:$0xff]  ;;  %s1836_s23 = sshll.u32 %s545_s30, 3 }
  0x20   : > { %1924 = vmatpush3.msra.mxu1 %v563_v2  ;;  %v2385_v5 = vld [vmem:[%s554_s18] sm:$0xff]  ;;  %s558_s18 = scalar_lea.vmem %s2674_s1, %s1837_s28  ;;  %s2215_s28 = smov 88  }
  0x21   : > { %1925 = vmatprep.subr.mxu1 %v2207_v1  ;;  %v560_v10 = vld [vmem:[%s558_s18] sm:$0xff]  ;;  %s2210_s18 = smov 120  }
  0x22   : > { %1926 = vmatpush3.msra.mxu1 %v562_v3  ;;  %v1841_v13 = vld [vmem:[%s2645_s5] ss:$0 sm:$0xff] }
  0x23   : > { %1927 = vmatprep.subr.mxu1 %v2207_v1  ;;  %v1839_v16 = vld [vmem:[%s2675_s3] ss:$0 sm:$0xff]  ;;  %s1734_s3 = scalar_lea.sflag [#allocation4], %s545_s30 }
  0x24   : > { %1928 = vmatpush3.msra.mxu1 %v561_v4 }
  0x25   : > { %1930 = vmatmul.mubr.msk.f32.vlgmr.msra.gmra.mxu1 %vm572_vm1, %v2385_v5  ;;  %1932 = vmatprep.subr.mxu1 %v2207_v1 }
  0x26   : > { %1933 = vmatpush3.msra.mxu1 %v649_v6  ;;  %1940 = vmatprep.mubr.msk.f32.mxu1 %vm2208_vm0, %v2207_v1 }
  0x27   : > { %1934 = vmatprep.subr.mxu1 %v2207_v1 }
  0x28   : > { %1935 = vmatpush3.msra.mxu1 %v648_v7 }
  0x29   : > { %1936 = vmatprep.subr.mxu1 %v2207_v1 }
  0x2a   : > { %1937 = vmatpush3.msra.mxu1 %v647_v8 }
  0x2b   : > { %1938 = vmatprep.subr.mxu1 %v2207_v1 }
  0x2c   : > { %1939 = vmatpush3.msra.mxu1 %v646_v9 }
  0x2d   : > { %1941 = vmatmul.mubr.msk.f32.vlgmr.msra.gmra.mxu1 %vm572_vm1, %v560_v10  ;;  %1948 = vmatprep.subr.mxu1 %v2207_v1 }
  0x2e   : > { %1950 = vmatprep.mubr.msk.f32.mxu1 %vm2208_vm0, %v2207_v1 }
  0xe5   : > { %v642_v11 = vpop.f32.mrf.mxu1 }
  0xe6   : > { %v643_v18 = vadd.f32 %v1839_v16, %v642_v11 }
  0xe7   : > { %v1931_v12 = vpop.f32.mrf.mxu1 }
  0xed   : > { %v726_v14 = vpop.f32.mrf.mxu1 }
  0xee   : > { %v2418_v15 = vadd.f32 %v1841_v13, %v726_v14  ;;  %v1412_v13 = vld [vmem:[%s2646_s6 + $0x18] sm:$0xff]  ;;  %v1411_v14 = vld [vmem:[%s2646_s6 + $0x10] sm:$0xff] }
  0xef   : > { %v1942_v17 = vpop.f32.mrf.mxu1 }
  0xf0   : > { %1068 = vrot.lane.b32.xlu1 %v2418_v15, %s2209_s25  ;;  %897 = vrot.lane.b32.xlu0 %v2418_v15, %s2210_s18  ;;  %v1409_v17 = vld [vmem:[%s2646_s6] sm:$0xff] }
  0xf1   : > { %1944 = vmatpush3.xpose.msk.msra.mxu0 %vm730_vm2, %v2418_v15 }
  0xf2   : > { %1953 = vmatprep.subr.mxu0 %v2207_v1 }
  0xf4   : > { %1946 = vmatmul.mubr.msk.f32.vlgmr.msra.gmra.mxu0 %vm730_vm2, %v643_v18  ;;  %1066 = vrot.lane.b32.xlu1 %v643_v18, %s2209_s25 }
  0xf5   : > { %895 = vrot.lane.b32.xlu0 %v643_v18, %s2210_s18  ;;  %1955 = vmatprep.mubr.msk.f32.mxu0 %vm2208_vm0, %v2207_v1  ;;  %s2219_s18 = smov [#allocation3]  }
  0xf8   : > { %1237 = vrot.lane.b32.xlu1 %v643_v18, %s2211_s19 }
  0xf9   : > { %1239 = vrot.lane.b32.xlu0 %v2418_v15, %s2211_s19  ;;  %s2133_s19 = sshll.u32 %s2219_s18, 4  ;;  %s2134_s19 = int_to_ptr.vmem [resolvable:$false] %s2133_s19 }
 0x162   : > { %v898_v19 = vpop.permute.xlu0 %897  ;;  %v1069_v20 = vpop.permute.xlu1 %1068 }
 0x163   : > { %1954 = vmatpush3.xpose.msk.msra.mxu0 %vm730_vm2, %v898_v19 }
 0x164   : > { %1963 = vmatprep.subr.mxu0 %v2207_v1 }
 0x166   : > { %v1067_v22 = vpop.permute.xlu1 %1066 }
 0x167   : > { %v896_v21 = vpop.permute.xlu0 %895 }
 0x168   : > { %1956 = vmatmul.mubr.msk.f32.vlgmr.msra.gmra.mxu0 %vm730_vm2, %v896_v21 }
 0x169   : > { %1964 = vmatpush3.xpose.msk.msra.mxu0 %vm730_vm2, %v1069_v20  ;;  %1965 = vmatprep.mubr.msk.f32.mxu0 %vm2208_vm0, %v2207_v1 }
 0x16a   : > { %1973 = vmatprep.subr.mxu0 %v2207_v1  ;;  %v1238_v24 = vpop.permute.xlu1 %1237 }
 0x16b   : > { %v1240_v23 = vpop.permute.xlu0 %1239 }
 0x16c   : > { %1966 = vmatmul.mubr.msk.f32.vlgmr.msra.gmra.mxu0 %vm730_vm2, %v1067_v22 }
 0x16d   : > { %1974 = vmatpush3.xpose.msk.msra.mxu0 %vm730_vm2, %v1240_v23  ;;  %1975 = vmatprep.mubr.msk.f32.mxu0 %vm2208_vm0, %v2207_v1 }
 0x16e   : > { %2005 = vmatprep.subr.mxu0 %v2207_v1 }
 0x170   : > { %1976 = vmatmul.mubr.msk.f32.vlgmr.msra.gmra.mxu0 %vm730_vm2, %v1238_v24 }
 0x171   : > { %2037 = vmatprep.mubr.msk.f32.mxu0 %vm2208_vm0, %v2207_v1 }
 0x1b4   : > { %v803_v25 = vpop.f32.mrf.mxu0 }
 0x1b5   : > { %v807_v26 = vsel %vm730_vm2, %v803_v25, -inf }
 0x1b6   : > { %808 = vmax.xlane.f32.xlu0 %v807_v26  ;;  %v1947_v27 = vpop.f32.mrf.mxu0 }
 0x1b7   : > { %v1855_v27 = vld [vmem:[%s2647_s7] ss:$0 sm:$0xff] }
 0x228   : > { %v969_v28 = vpop.f32.mrf.mxu0 }
 0x229   : > { %v973_v29 = vsel %vm730_vm2, %v969_v28, -inf }
 0x22a   : > { %974 = vmax.xlane.f32.xlu1 %v973_v29  ;;  %v1957_v30 = vpop.f32.mrf.mxu0 }
 0x22c   : > { %v1140_v31 = vpop.f32.mrf.mxu0 }
 0x22d   : > { %v1144_v32 = vsel %vm730_vm2, %v1140_v31, -inf }
 0x22e   : > { %1145 = vmax.xlane.f32.xlu0 %v1144_v32  ;;  %v1967_v33 = vpop.f32.mrf.mxu0 }
 0x230   : > { %v1311_v34 = vpop.f32.mrf.mxu0 }
 0x231   : > { %v1315_v35 = vsel %vm730_vm2, %v1311_v34, -inf }
 0x232   : > { %1316 = vmax.xlane.f32.xlu0 %v1315_v35  ;;  %v1977_v36 = vpop.f32.mrf.mxu0 }
 0x23b   : > { %818 = vrot.lane.b32.xlu1 %v2418_v15, %s2212_s17 }
 0x23f   : > { %v809_v37 = vpop.xlane.xlu0 %808 }
 0x240   : > { %v810_v38 = vsub.f32 %v803_v25, %v809_v37 }
 0x242   : > { %v811_v39 = vmul.f32 1.442695, %v810_v38  ;;  %v1527_v38 = vld [vmem:[%s2650_s10 + $0x18] sm:$0xff] }
 0x244   : > { %2107 = vpow2.f32 %v811_v39  ;;  %v1526_v39 = vld [vmem:[%s2650_s10 + $0x10] sm:$0xff] }
 0x251   : > { %v2108_v40 = vpop.eup %2107 }
 0x252   : > { %v813_v41 = vsel %vm730_vm2, %v2108_v40, 0.0 }
 0x25f   : > { %814 = vadd.xlane.f32.xlu1 %v813_v41  ;;  %v1624_v41 = vld [vmem:[%s2652_s12 + $0x78] sm:$0xff] }
 0x260   : > { %2006 = vmatpush3.msra.mxu0 %v1624_v41 }
 0x261   : > { %2007 = vmatprep.subr.mxu0 %v2207_v1 }
 0x2b3   : > { %v975_v42 = vpop.xlane.xlu1 %974 }
 0x2b4   : > { %v976_v43 = vsub.f32 %v969_v28, %v975_v42  ;;  %v1623_v42 = vld [vmem:[%s2652_s12 + $0x70] sm:$0xff] }
 0x2b5   : > { %2008 = vmatpush3.msra.mxu0 %v1623_v42 }
 0x2b6   : > { %v977_v44 = vmul.f32 1.442695, %v976_v43  ;;  %v1622_v43 = vld [vmem:[%s2652_s12 + $0x68] sm:$0xff]  ;;  %2009 = vmatprep.subr.mxu0 %v2207_v1 }
 0x2b7   : > { %v819_v45 = vpop.permute.xlu1 %818  ;;  %v1146_v46 = vpop.xlane.xlu0 %1145  ;;  %2010 = vmatpush3.msra.mxu0 %v1622_v43 }
 0x2b8   : > { %2109 = vpow2.f32 %v977_v44  ;;  %v1147_v47 = vsub.f32 %v1140_v31, %v1146_v46  ;;  %1949 = vmatpush3.msra.mxu1 %v819_v45  ;;  %v1621_v44 = vld [vmem:[%s2652_s12 + $0x60] sm:$0xff]  ;;  %2011 = vmatprep.subr.mxu0 %v2207_v1  ;;  %v1620_v45 = vld [vmem:[%s2652_s12 + $0x58] sm:$0xff]  ;;  %v1619_v46 = vld [vmem:[%s2652_s12 + $0x50] sm:$0xff] }
 0x2b9   : > { %1958 = vmatprep.subr.mxu1 %v2207_v1  ;;  %2012 = vmatpush3.msra.mxu0 %v1621_v44 }
 0x2ba   : > { %v1148_v48 = vmul.f32 1.442695, %v1147_v47  ;;  %2013 = vmatprep.subr.mxu0 %v2207_v1  ;;  %v1618_v47 = vld [vmem:[%s2652_s12 + $0x48] sm:$0xff] }
 0x2bb   : > { %v1317_v49 = vpop.xlane.xlu0 %1316  ;;  %2014 = vmatpush3.msra.mxu0 %v1620_v45 }
 0x2bc   : > { %2111 = vpow2.f32 %v1148_v48  ;;  %v1318_v50 = vsub.f32 %v1311_v34, %v1317_v49  ;;  %2015 = vmatprep.subr.mxu0 %v2207_v1 }
 0x2bd   : > { %2016 = vmatpush3.msra.mxu0 %v1619_v46 }
 0x2be   : > { %v1319_v51 = vmul.f32 1.442695, %v1318_v50  ;;  %2017 = vmatprep.subr.mxu0 %v2207_v1 }
 0x2bf   : > { %2018 = vmatpush3.msra.mxu0 %v1618_v47 }
 0x2c0   : > { %2113 = vpow2.f32 %v1319_v51  ;;  %2019 = vmatprep.subr.mxu0 %v2207_v1 }
 0x2c5   : > { %v2110_v52 = vpop.eup %2109 }
 0x2c6   : > { %v979_v53 = vsel %vm730_vm2, %v2110_v52, 0.0 }
 0x2c7   : > { %980 = vadd.xlane.f32.xlu0 %v979_v53 }
 0x2c9   : > { %v2112_v54 = vpop.eup %2111 }
 0x2ca   : > { %v1150_v55 = vsel %vm730_vm2, %v2112_v54, 0.0 }
 0x2cb   : > { %1151 = vadd.xlane.f32.xlu1 %v1150_v55 }
 0x2cd   : > { %v2114_v56 = vpop.eup %2113 }
 0x2ce   : > { %v1321_v57 = vsel %vm730_vm2, %v2114_v56, 0.0 }
 0x2cf   : > { %1322 = vadd.xlane.f32.xlu0 %v1321_v57  ;;  %v1617_v57 = vld [vmem:[%s2652_s12 + $0x40] sm:$0xff] }
 0x2d0   : > { %2020 = vmatpush3.msra.mxu0 %v1617_v57 }
 0x2d1   : > { %2021 = vmatprep.subr.mxu0 %v2207_v1 }
 0x2dc   : > { %1155 = vrot.lane.b32.xlu1 %v2418_v15, %s2213_s20  ;;  %s1865_s20 = sshll.u32 %s2197_s24, 7  ;;  %s2135_s24 = scalar_lea.vmem %s2134_s19, 256 }
 0x2dd   : > { %s1746_s2 = scalar_lea.hbm %s2656_s16, %s1865_s20 }
 0x2e0   : > { %1326 = vrot.lane.b32.xlu1 %v2418_v15, %s2214_s27  ;;  %s2216_s27 = smov 8  }
 0x2e5   : > { %984 = vrot.lane.b32.xlu0 %v2418_v15, %s2215_s28  ;;  %v1410_v15 = vld [vmem:[%s2646_s6 + $0x8] sm:$0xff]  ;;  %s2217_s28 = smov 16  }
 0x2e8   : > { %v815_v58 = vpop.xlane.xlu1 %814 }
 0x2e9   : > { %2115 = vrcp.f32 %v815_v58  ;;  %v1616_v58 = vld [vmem:[%s2652_s12 + $0x38] sm:$0xff] }
 0x2ea   : > { %2022 = vmatpush3.msra.mxu0 %v1616_v58 }
 0x2eb   : > { %2023 = vmatprep.subr.mxu0 %v2207_v1 }
 0x2f6   : > { %v2116_v59 = vpop.eup %2115 }
 0x2f7   : > { %v817_v60 = vmul.f32 %v2116_v59, %v2108_v40  ;;  %v1524_v40 = vld [vmem:[%s2650_s10] sm:$0xff]  ;;  %v1615_v59 = vld [vmem:[%s2652_s12 + $0x30] sm:$0xff] }
 0x2f8   : > { %2024 = vmatpush3.msra.mxu0 %v1615_v59 }
 0x2f9   : > { %1951 = vmatmul.mubr.msk.f32.vlgmr.msra.gmra.mxu1 %vm730_vm2, %v817_v60  ;;  %v1614_v60 = vld [vmem:[%s2652_s12 + $0x28] sm:$0xff]  ;;  %2025 = vmatprep.subr.mxu0 %v2207_v1 }
 0x2fa   : > { %1960 = vmatprep.mubr.msk.f32.mxu1 %vm2208_vm0, %v2207_v1  ;;  %2026 = vmatpush3.msra.mxu0 %v1614_v60 }
 0x2fb   : > { %2027 = vmatprep.subr.mxu0 %v2207_v1 }
 0x350   : > { %v981_v61 = vpop.xlane.xlu0 %980 }
 0x351   : > { %2117 = vrcp.f32 %v981_v61  ;;  %v1613_v61 = vld [vmem:[%s2652_s12 + $0x20] sm:$0xff] }
 0x352   : > { %2028 = vmatpush3.msra.mxu0 %v1613_v61 }
 0x353   : > { %2029 = vmatprep.subr.mxu0 %v2207_v1 }
 0x354   : > { %v1152_v62 = vpop.xlane.xlu1 %1151 }
 0x355   : > { %2119 = vrcp.f32 %v1152_v62  ;;  %v1612_v62 = vld [vmem:[%s2652_s12 + $0x18] sm:$0xff] }
 0x356   : > { %2030 = vmatpush3.msra.mxu0 %v1612_v62 }
 0x357   : > { %2031 = vmatprep.subr.mxu0 %v2207_v1 }
 0x358   : > { %v1323_v63 = vpop.xlane.xlu0 %1322  ;;  %v1156_v3 = vpop.permute.xlu1 %1155 }
 0x359   : > { %2121 = vrcp.f32 %v1323_v63  ;;  %v1611_v63 = vld [vmem:[%s2652_s12 + $0x10] sm:$0xff] }
 0x35a   : > { %2032 = vmatpush3.msra.mxu0 %v1611_v63 }
 0x35b   : > { %2033 = vmatprep.subr.mxu0 %v2207_v1 }
 0x35c   : > { %v985_v0 = vpop.permute.xlu0 %984  ;;  %v1327_v8 = vpop.permute.xlu1 %1326 }
 0x35d   : > { %1959 = vmatpush3.msra.mxu1 %v985_v0  ;;  %v1610_v0 = vld [vmem:[%s2652_s12 + $0x8] sm:$0xff] }
 0x35e   : > { %v2118_v2 = vpop.eup %2117  ;;  %1968 = vmatprep.subr.mxu1 %v2207_v1  ;;  %2034 = vmatpush3.msra.mxu0 %v1610_v0 }
 0x35f   : > { %v983_v4 = vmul.f32 %v2118_v2, %v2110_v52  ;;  %v1857_v52 = vld [vmem:[%s2648_s8] ss:$0 sm:$0xff]  ;;  %2035 = vmatprep.subr.mxu0 %v2207_v1 }
 0x360   : > { %v1609_v2 = vld [vmem:[%s2652_s12] sm:$0xff] }
 0x361   : > { %1961 = vmatmul.mubr.msk.f32.vlgmr.msra.gmra.mxu1 %vm730_vm2, %v983_v4  ;;  %2036 = vmatpush3.msra.mxu0 %v1609_v2 }
 0x362   : > { %v2120_v6 = vpop.eup %2119  ;;  %1969 = vmatpush3.msra.mxu1 %v1156_v3  ;;  %1970 = vmatprep.mubr.msk.f32.mxu1 %vm2208_vm0, %v2207_v1  ;;  %v1859_v3 = vld [vmem:[%s2651_s11] ss:$0 sm:$0xff] }
 0x363   : > { %1978 = vmatprep.subr.mxu1 %v2207_v1  ;;  %v1154_v7 = vmul.f32 %v2120_v6, %v2112_v54  ;;  %v1858_v54 = vld [vmem:[%s2649_s9] ss:$0 sm:$0xff] }
 0x365   : > { %1971 = vmatmul.mubr.msk.f32.vlgmr.msra.gmra.mxu1 %vm730_vm2, %v1154_v7 }
 0x366   : > { %v2122_v9 = vpop.eup %2121  ;;  %1979 = vmatpush3.msra.mxu1 %v1327_v8  ;;  %1980 = vmatprep.mubr.msk.f32.mxu1 %vm2208_vm0, %v2207_v1 }
 0x367   : > { %v1325_v10 = vmul.f32 %v2122_v9, %v2114_v56  ;;  %1983 = vmatprep.subr.mxu1 %v2207_v1  ;;  %v1861_v9 = vld [vmem:[%s2653_s13] ss:$0 sm:$0xff] }
 0x369   : > { %1981 = vmatmul.mubr.msk.f32.vlgmr.msra.gmra.mxu1 %vm730_vm2, %v1325_v10 }
 0x36a   : > { %1991 = vmatprep.mubr.msk.f32.mxu1 %vm2208_vm0, %v2207_v1  ;;  %1984 = vmatpush3.msra.mxu1 %v1412_v13 }
 0x36b   : > { %1985 = vmatprep.subr.mxu1 %v2207_v1 }
 0x36c   : > { %1986 = vmatpush3.msra.mxu1 %v1411_v14 }
 0x36d   : > { %1987 = vmatprep.subr.mxu1 %v2207_v1 }
 0x36e   : > { %1988 = vmatpush3.msra.mxu1 %v1410_v15 }
 0x36f   : > { %1989 = vmatprep.subr.mxu1 %v2207_v1 }
 0x370   : > { %1990 = vmatpush3.msra.mxu1 %v1409_v17 }
 0x371   : > { %1994 = vmatprep.subr.mxu1 %v2207_v1 }
 0x3b9   : > { %v890_v11 = vpop.f32.mrf.mxu1 }
 0x3ba   : > { %894 = vst.msk [vmem:[#allocation2] sm:$0xff] %vm730_vm2, %v890_v11 }
 0x3bb   : > { %v1952_v12 = vpop.f32.mrf.mxu1 }
 0x421   : > { %v1056_v16 = vpop.f32.mrf.mxu1 }
 0x422   : > { %1061 = vrot.lane.b32.xlu0 %v1056_v16, %s2216_s27  ;;  %s547_s27 = scalar_lea.vmem [#allocation3], %s1836_s23 }
 0x423   : > { %v1962_v18 = vpop.f32.mrf.mxu1 }
 0x425   : > { %v1227_v19 = vpop.f32.mrf.mxu1 }
 0x426   : > { %1232 = vrot.lane.b32.xlu1 %v1227_v19, %s2217_s28  ;;  %s1748_s28 = sshll.u32 %s547_s27, 4  ;;  %s1749_s28 = int_to_ptr.vmem [resolvable:$true] %s1748_s28 }
 0x427   : > { %v1972_v20 = vpop.f32.mrf.mxu1  ;;  %s2129_s25 = scalar_lea.vmem %s1749_s28, 128  ;;  %p2136_p1 = scmp.lt.s32.totalorder %s1749_s28, %s2134_s19 }
 0x428   : > { %p2130_p12 = scmp.ne.s32.totalorder %s1749_s28, %s2129_s25  ;;  %p2137_p2 = scmp.lt.s32.totalorder %s2135_s24, %s2129_s25 }
 0x429   : > { %v1398_v21 = vpop.f32.mrf.mxu1 }
 0x42a   : > { %1403 = vrot.lane.b32.xlu0 %v1398_v21, %s2218_s29  ;;  %p2131_p13 = pnand %p2130_p12, %p2345_p4  ;;  %p2138_p3 = por %p2137_p2, %p2136_p1 }
 0x42b   : > { %v1982_v22 = vpop.f32.mrf.mxu1 }
 0x42c   : > { %p2132_p0 = pneg %p2131_p13 }
 0x42e   : > { %p2139_p5 = pnand %p2138_p3, %p2132_p0 }
 0x494   : > { %v1062_v23 = vpop.permute.xlu0 %1061 }
 0x495   : > { %1065 = vst.msk [vmem:[#allocation2] sm:$0xff] %vm1064_vm3, %v1062_v23  ;;  %v1862_v23 = vld [vmem:[%s2654_s14] ss:$0 sm:$0xff] }
 0x498   : > { %v1233_v24 = vpop.permute.xlu1 %1232 }
 0x499   : > { %1236 = vst.msk [vmem:[#allocation2] sm:$0xff] %vm1235_vm4, %v1233_v24 }
 0x49c   : > { %v1404_v25 = vpop.permute.xlu0 %1403 }
 0x49d   : > { %1407 = vst.msk [vmem:[#allocation2] sm:$0xff] %vm1406_vm5, %v1404_v25  ;;  %v1863_v25 = vld [vmem:[%s2655_s15] ss:$0 sm:$0xff] }
 0x4a4   : > { %v1408_v26 = vld [vmem:[#allocation2] sm:$0xff] }
 0x4a5   : > { %1992 = vmatmul.mubr.msk.f32.vlgmr.msra.gmra.mxu1 %vm572_vm1, %v1408_v26 }
 0x4a6   : > { %2002 = vmatprep.mubr.msk.f32.mxu1 %vm2208_vm0, %v2207_v1  ;;  %1995 = vmatpush3.msra.mxu1 %v1527_v38 }
 0x4a7   : > { %1996 = vmatprep.subr.mxu1 %v2207_v1 }
 0x4a8   : > { %1997 = vmatpush3.msra.mxu1 %v1526_v39 }
 0x4a9   : > { %1998 = vmatprep.subr.mxu1 %v2207_v1 }
 0x565   : > { %v1489_v28 = vpop.f32.mrf.mxu1 }
 0x566   : > { %v1490_v29 = vadd.f32 %v1855_v27, %v1489_v28 }
 0x567   : > { %v1993_v30 = vpop.f32.mrf.mxu1 }
 0x568   : > { %v1493_v31 = vadd.f32 %v1490_v29, %v2385_v5  ;;  %v1525_v5 = vld [vmem:[%s2650_s10 + $0x8] sm:$0xff] }
 0x569   : > { %1999 = vmatpush3.msra.mxu1 %v1525_v5 }
 0x56a   : > { %v1496_v32 = vsel %vm572_vm1, %v1493_v31, 0.0  ;;  %2000 = vmatprep.subr.mxu1 %v2207_v1 }
 0x56b   : > { %1497 = vadd.xlane.f32.xlu1 %v1496_v32  ;;  %2001 = vmatpush3.msra.mxu1 %v1524_v40 }
 0x5f4   : > { %v1498_v33 = vpop.xlane.xlu1 %1497 }
 0x5f5   : > { %v1500_v34 = vmul.f32 0.03125, %v1498_v33 }
 0x5f7   : > { %v1501_v35 = vsub.f32 %v1493_v31, %v1500_v34 }
 0x5f9   : > { %v1502_v36 = vmul.f32 %v1501_v35, %v1501_v35 }
 0x5fb   : > { %v1503_v37 = vsel %vm572_vm1, %v1502_v36, 0.0 }
 0x5fc   : > { %1504 = vadd.xlane.f32.xlu0 %v1503_v37 }
 0x685   : > { %v1505_v48 = vpop.xlane.xlu0 %1504 }
 0x686   : > { %v1506_v49 = vmul.f32 0.03125, %v1505_v48 }
 0x688   : > { %v1507_v50 = vadd.f32 1e-05, %v1506_v49 }
 0x68a   : > { %2123 = vrsqrt.f32 %v1507_v50 }
 0x697   : > { %v2124_v51 = vpop.eup %2123 }
 0x698   : > { %v1509_v53 = vmul.f32 %v2124_v51, %v1501_v35 }
 0x69a   : > { %v1516_v55 = vmul.f32 %v1857_v52, %v1509_v53 }
 0x69c   : > { %v1523_v56 = vadd.f32 %v1858_v54, %v1516_v55 }
 0x69e   : > { %2003 = vmatmul.mubr.msk.f32.vlgmr.msra.gmra.mxu1 %vm572_vm1, %v1523_v56 }
 0x75e   : > { %v1604_v4 = vpop.f32.mrf.mxu1 }
 0x75f   : > { %v1605_v6 = vadd.f32 %v1859_v3, %v1604_v4 }
 0x760   : > { %v2004_v7 = vpop.f32.mrf.mxu1 }
 0x761   : > { %2125 = vtanh.f32 %v1605_v6 }
 0x76e   : > { %v2126_v8 = vpop.eup %2125 }
 0x76f   : > { %2038 = vmatmul.mubr.f32.vlgmr.msra.gmra.mxu0 %v2126_v8 }
 0x82f   : > { %v1698_v10 = vpop.f32.mrf.mxu0 }
 0x830   : > { %v1699_v11 = vadd.f32 %v1861_v9, %v1698_v10 }
 0x831   : > { %v2039_v12 = vpop.f32.mrf.mxu0 }
 0x832   : > { %v1702_v1 = vadd.f32 %v1699_v11, %v1523_v56 }
 0x834   : > { %v1705_v13 = vsel %vm572_vm1, %v1702_v1, 0.0 }
 0x835   : > { %1706 = vadd.xlane.f32.xlu0 %v1705_v13 }
 0x8be   : > { %v1707_v14 = vpop.xlane.xlu0 %1706 }
 0x8bf   : > { %v1708_v15 = vmul.f32 0.03125, %v1707_v14 }
 0x8c1   : > { %v1709_v16 = vsub.f32 %v1702_v1, %v1708_v15 }
 0x8c3   : > { %v1710_v17 = vmul.f32 %v1709_v16, %v1709_v16 }
 0x8c5   : > { %v1711_v18 = vsel %vm572_vm1, %v1710_v17, 0.0 }
 0x8c6   : > { %1712 = vadd.xlane.f32.xlu1 %v1711_v18 }
 0x94f   : > { %v1713_v19 = vpop.xlane.xlu1 %1712 }
 0x950   : > { %v1714_v20 = vmul.f32 0.03125, %v1713_v19 }
 0x952   : > { %v1715_v21 = vadd.f32 1e-05, %v1714_v20 }
 0x954   : > { %2127 = vrsqrt.f32 %v1715_v21 }
 0x961   : > { %v2128_v22 = vpop.eup %2127 }
 0x962   : > { %v1717_v24 = vmul.f32 %v2128_v22, %v1709_v16 }
 0x964   : > { %v1724_v26 = vmul.f32 %v1862_v23, %v1717_v24 }
 0x966   : > { %v1731_v27 = vadd.f32 %v1863_v25, %v1724_v26 }
 0x968   : > { %1732 = vst.msk [vmem:[%s547_s27] sm:$0xff] %vm572_vm1, %v1731_v27 }
 0x969   : > { %2142 = shalt.err (!%p2139_p5)
}
 0x96a   : > { %s2143_s1 = scalar_lea.hbm %s1746_s2, 128  ;;  %s2147_s17 = scalar_lea.hbm %s2656_s16, 256 }
 0x96b   : > { %p2144_p6 = scmp.ne.s32.totalorder %s1746_s2, %s2143_s1  ;;  %p2148_p10 = scmp.lt.s32.totalorder %s1746_s2, %s2656_s16 }
 0x96c   : > { %p2149_p11 = scmp.lt.s32.totalorder %s2147_s17, %s2143_s1 }
 0x96d   : > { %p2145_p7 = pnand %p2144_p6, %p2345_p4 }
 0x96e   : > { %p2150_p12 = por %p2149_p11, %p2148_p10 }
 0x96f   : > { %p2146_p9 = pneg %p2145_p7 }
 0x971   : > { %p2151_p13 = pnand %p2150_p12, %p2146_p9 }
 0x973   : > { %2154 = shalt.err (!%p2151_p13)
}
 0x974   : > { %2040 = dma.vmem_to_hbm [thread:$0]  (%p2345_p4), %s1749_s28, 128, %s1746_s2, %s1734_s3  }
 0x975 PF: > { %p2046_p0 = scmp.ge.s32.totalorder %s2205_s26, 2  ;;  %s1760_s25 = sand.u32 1, %s2185_s21  }
 0x976   : > { %s1761_s18 = scalar_lea.sflag [#allocation4], %s1760_s25 }
 0x977   : > { %p2043_p1 = pnand %p2046_p0, %p2352_p8 }
 0x979   : > { %p2044_p2 = pneg %p2043_p1 }
 0x97b   : > { %2180 = dma.done.wait (%p2044_p2), %s1761_s18, 128  }
 0x97c   : > { %2182 = vsyncadd (%p2044_p2), %s1761_s18, 4294967168  ;;  %s29_s26 = sadd.s32 1, %s2205_s26   ;;  %s2677_s19 = sld [smem:[#allocation6_spill]] }
 0x97d   : > { %p26_p3 = scmp.ge.s32.totalorder %s29_s26, 4   ;;  %s2678_s23 = sld [smem:[#allocation10_spill]] }
 0x97e   : > { %s2679_s24 = sld [smem:[#allocation7_spill]]  ;;  %s2681_s21 = smov %s2189_s22 }
 0x97f   : > { %s2680_s25 = sld [smem:[#allocation8_spill]]  ;;  %28 = sbr.rel (!%p26_p3) target bundleno = 9 (0x9), region = 122 }
 0x982   : > { %s2682_s22 = smov %s2677_s19 }
 0x984   :  { %1766 = vsyncpa [#allocation4], 1 }
 0x985   :  { %1768 = vsyncpa [#allocation4 + $0x1], 1 }

</bundles_post_ra>
